<compile_context>
chip_gen: v7x
topology: tpu7x:2x2x1
jax: 0.10.0
libtpu: 0.0.40
codegen_flags: <defaults>
</compile_context>

<pallas_src>
import jax
import jax.numpy as jnp
from jax.experimental import pallas as pl
from jax.experimental.pallas import tpu as pltpu

OPENAI_CLIP_MEAN = (0.48145466, 0.4578275, 0.40821073)
OPENAI_CLIP_STD = (0.26862954, 0.26130258, 0.27577711)
VAE_SCALING_FACTOR = 0.18215


def _vmem_capacity_bytes():
    """Best-effort physical-VMEM query; conservative (v7x, 64 MiB) fallback."""
    try:
        info = pltpu.get_tpu_info()
        for attr in ("vmem_capacity_bytes", "vmem_size_bytes", "vmem_bytes"):
            val = getattr(info, attr, None)
            if val:
                return int(val)
    except Exception:
        pass
    return 64 << 20


# ----------------------------------------------------------------------------
# Kernel 1: fused scheduler algebra + guided-noise update (single affine pass).
#   sample = A*latent + B*eps,  A = (sqrt_beta/sqrt_alpha + 1 - sqrt_beta)/s
#                               B = -(beta/sqrt_alpha)/s
#   noise_pred_guided = eps - sqrt_beta * grads
# ----------------------------------------------------------------------------
def _sched_guidance_kernel(scal_ref, lat_ref, eps_ref, grad_ref,
                           sample_ref, guided_ref):
    a = scal_ref[0]
    b = scal_ref[1]
    sqrt_beta = scal_ref[2]
    eps = eps_ref[...]
    sample_ref[...] = a * lat_ref[...] + b * eps
    guided_ref[...] = eps - sqrt_beta * grad_ref[...]


def scheduler_and_guidance(latent2d, noise2d, grads2d,
                           coeff_a, coeff_b, sqrt_beta):
    r, c = latent2d.shape
    scal = jnp.stack([coeff_a, coeff_b, sqrt_beta]).astype(jnp.float32)
    return pl.pallas_call(
        _sched_guidance_kernel,
        out_shape=(jax.ShapeDtypeStruct((r, c), jnp.float32),
                   jax.ShapeDtypeStruct((r, c), jnp.float32)),
        grid=(1,),
        in_specs=[
            pl.BlockSpec(memory_space=pltpu.MemorySpace.SMEM),
            pl.BlockSpec((r, c), lambda i: (0, 0)),
            pl.BlockSpec((r, c), lambda i: (0, 0)),
            pl.BlockSpec((r, c), lambda i: (0, 0)),
        ],
        out_specs=(pl.BlockSpec((r, c), lambda i: (0, 0)),
                   pl.BlockSpec((r, c), lambda i: (0, 0))),
    )(scal, latent2d, noise2d, grads2d)


# ----------------------------------------------------------------------------
# Kernel 2: fused preprocessing (one launch):
#   decoded image -> [0,1] clamp -> CLIP per-channel normalize (pre-resize:
#   a per-channel affine commutes with bilinear interpolation), emitted bf16,
#   and CLIP-embedding L2 normalization (eps-guarded), emitted bf16 for MXU.
# ----------------------------------------------------------------------------
def _preprocess_kernel(img_ref, mean_ref, invstd_ref, emb_ref,
                       img_out_ref, embn_ref):
    x = jnp.clip(img_ref[...] * 0.5 + 0.5, 0.0, 1.0)
    img_out_ref[...] = ((x - mean_ref[...]) * invstd_ref[...]
                        ).astype(img_out_ref.dtype)
    e = emb_ref[...]
    norm = jnp.sqrt(jnp.sum(e * e, axis=1, keepdims=True))
    embn_ref[...] = (e / jnp.maximum(norm, 1e-12)).astype(embn_ref.dtype)


def preprocess(img2d, mean_rows, invstd_rows, embedding):
    r, c = img2d.shape
    b, d = embedding.shape
    return pl.pallas_call(
        _preprocess_kernel,
        out_shape=(jax.ShapeDtypeStruct((r, c), jnp.bfloat16),
                   jax.ShapeDtypeStruct((b, d), jnp.bfloat16)),
        grid=(1,),
        in_specs=[
            pl.BlockSpec((r, c), lambda i: (0, 0)),
            pl.BlockSpec((r, 1), lambda i: (0, 0)),
            pl.BlockSpec((r, 1), lambda i: (0, 0)),
            pl.BlockSpec((b, d), lambda i: (0, 0)),
        ],
        out_specs=(pl.BlockSpec((r, c), lambda i: (0, 0)),
                   pl.BlockSpec((b, d), lambda i: (0, 0))),
    )(img2d, mean_rows, invstd_rows, embedding)


# ----------------------------------------------------------------------------
# Kernel 3: fMRI head GEMV (bf16 W streamed, f32 MXU accumulation) with the
# loss reduction fused in as per-tile partial sums.  V is tiled over a
# *parallel* grid (no resident accumulator -> v7x shards the weight stream
# across both TensorCores).  Padded voxels have zero weight & bias, so they
# contribute exactly 0 to the partial sums.
# ----------------------------------------------------------------------------
def _fmri_pred_kernel(emb_ref, w_ref, b_ref, pred_ref, psum_ref):
    pred = jnp.dot(emb_ref[...], w_ref[...],
                   preferred_element_type=jnp.float32) + b_ref[...]
    pred_ref[...] = pred
    # Lane-padded partial sum (unmasked store); wrapper reads lane 0 per tile.
    psum_ref[...] = jnp.full((1, 128), jnp.sum(pred), dtype=jnp.float32)


def fmri_head(emb_bf16, w_pad, bias_pad, roi_sum, clip_guidance_scale,
              tile_v, n_voxels, vmem_limit_bytes):
    b, d = emb_bf16.shape
    _, v_pad = w_pad.shape
    n_tiles = v_pad // tile_v
    pred_pad, psum = pl.pallas_call(
        _fmri_pred_kernel,
        out_shape=(jax.ShapeDtypeStruct((b, v_pad), jnp.float32),
                   jax.ShapeDtypeStruct((1, n_tiles * 128), jnp.float32)),
        grid=(n_tiles,),
        in_specs=[
            pl.BlockSpec((b, d), lambda j: (0, 0)),
            pl.BlockSpec((d, tile_v), lambda j: (0, j)),
            pl.BlockSpec((1, tile_v), lambda j: (0, j)),
        ],
        out_specs=(pl.BlockSpec((b, tile_v), lambda j: (0, j)),
                   pl.BlockSpec((1, 128), lambda j: (0, j))),
        compiler_params=pltpu.CompilerParams(
            dimension_semantics=("parallel",),
            vmem_limit_bytes=vmem_limit_bytes),
    )(emb_bf16, w_pad, bias_pad)
    partials = psum.reshape(n_tiles, 128)[:, 0]
    loss = jnp.sum(partials) * (clip_guidance_scale / roi_sum)
    return pred_pad[:, :n_voxels], loss


# ----------------------------------------------------------------------------
# One-time setup: everything that is constant across diffusion steps.
# ----------------------------------------------------------------------------
def braindive_setup(weight, bias, roi, image_shape, tile_v_cap=None):
    """weight: (D, V) f32 (post-ROI, transposed as in load_roi); bias/roi: (V,);
    image_shape: decoded-VAE image NCHW shape."""
    d, v = weight.shape
    bi, ci, hi, wi = image_shape

    if tile_v_cap is None:
        # 128 MiB-VMEM chips (v5e/v6e) can stream bigger W blocks than v7x.
        tile_v_cap = 16384 if _vmem_capacity_bytes() >= (100 << 20) else 8192
    v128 = pl.cdiv(v, 128) * 128
    # >=2 grid steps whenever possible so v7x's two TensorCores split the
    # weight stream; cap keeps double-buffered bf16 W tiles inside VMEM.
    tile_v = min(tile_v_cap, max(128, pl.cdiv(v128, 256) * 128))
    v_pad = pl.cdiv(v128, tile_v) * tile_v

    # Weight cast + padding done ONCE here (not per guidance step).
    # TODO(synk): bf16 weights quantize the head slightly vs the f32 PyTorch
    # Linear; keep f32 here if bit-faithfulness to the reference is required.
    w_pad = weight.astype(jnp.bfloat16)
    bias_pad = bias.reshape(1, v).astype(jnp.float32)
    if v_pad != v:
        w_pad = jnp.pad(w_pad, ((0, 0), (0, v_pad - v)))
        bias_pad = jnp.pad(bias_pad, ((0, 0), (0, v_pad - v)))

    vmem_need = (2 * d * tile_v * 2        # double-buffered bf16 W tiles
                 + 2 * tile_v * 4          # pred tiles
                 + 2 * tile_v * 4          # bias tiles
                 + d * 2 + 2 * 128 * 4) + (4 << 20)
    vmem_limit = int(max(32 << 20, vmem_need))

    # Sublane+lane dense layout for the image preprocessing kernel and the
    # matching per-row CLIP mean / inverse-std constants.
    n_px = hi * wi
    if n_px % 128 == 0:
        rows_per_chan = n_px // 128
        pp_shape = (bi * ci * rows_per_chan, 128)
    else:
        rows_per_chan = 1
        pp_shape = (bi * ci, n_px)
    mean = jnp.asarray(OPENAI_CLIP_MEAN, jnp.float32)
    invstd = 1.0 / jnp.asarray(OPENAI_CLIP_STD, jnp.float32)
    mean_rows = jnp.tile(jnp.repeat(mean, rows_per_chan),
                         bi).reshape(pp_shape[0], 1)
    invstd_rows = jnp.tile(jnp.repeat(invstd, rows_per_chan),
                           bi).reshape(pp_shape[0], 1)

    return dict(w_pad=w_pad, bias_pad=bias_pad,
                roi_sum=jnp.sum(roi).astype(jnp.float32),
                tile_v=tile_v, n_voxels=v, vmem_limit=vmem_limit,
                pp_shape=pp_shape, mean_rows=mean_rows,
                invstd_rows=invstd_rows)


# ----------------------------------------------------------------------------
# Wrapper mirroring BrainDiVE.brainProcess (DDIM / PNDM / DPMSolver branch).
# ----------------------------------------------------------------------------
def braindive_guidance_step(params, latent, noise_pred, decoded_image,
                            clip_embedding, latent_grads,
                            alpha_prod_t, clip_guidance_scale):
    """latent/noise_pred/latent_grads: (B,4,H,W); decoded_image: (B,3,Hi,Wi)
    in [-1,1]; clip_embedding: (B,D)."""
    b, c, h, w = latent.shape
    n = b * c * h * w
    lat_shape = (n // 128, 128) if n % 128 == 0 else (b * c, h * w)

    alpha = alpha_prod_t.astype(jnp.float32)
    sqrt_alpha = jnp.sqrt(alpha)
    sqrt_beta = jnp.sqrt(1.0 - alpha)
    inv_scale = jnp.float32(1.0 / VAE_SCALING_FACTOR)
    # sample = (pred_orig*sqrt_beta + latent*(1-sqrt_beta)) / vae_scale with
    # pred_orig = (latent - sqrt_beta*eps)/sqrt_alpha, collapsed to one affine:
    coeff_a = (sqrt_beta / sqrt_alpha + 1.0 - sqrt_beta) * inv_scale
    coeff_b = -((1.0 - alpha) / sqrt_alpha) * inv_scale

    # TODO(synk): scheduler.scale_model_input is identity for DDIM/PNDM; the
    # UNet noise prediction is an external pretrained model, so `noise_pred`
    # stands in for both its output and `noise_orignal`.
    # TODO(synk): grads = autograd(loss -> latent) flows through the external
    # UNet/VAE/CLIP graph and cannot be reproduced; `latent_grads` stands in.
    sample2d, guided2d = scheduler_and_guidance(
        latent.reshape(lat_shape),
        noise_pred.reshape(lat_shape),
        latent_grads.reshape(lat_shape),
        coeff_a, coeff_b, sqrt_beta)
    sample = sample2d.reshape(b, c, h, w)
    noise_pred_guided = guided2d.reshape(b, c, h, w)

    # TODO(synk): pipe.vae.decode(sample) is an external pretrained VAE;
    # `decoded_image` stands in for its output.
    bi, ci, hi, wi = decoded_image.shape
    norm_small2d, emb_n = preprocess(
        decoded_image.reshape(params["pp_shape"]),
        params["mean_rows"], params["invstd_rows"],
        clip_embedding.astype(jnp.float32))
    norm_small = norm_small2d.reshape(bi, ci, hi, wi)

    # Bilinear resize to 224 (glue, mem-bound XLA op), done in bf16; CLIP
    # normalization was applied pre-resize (per-channel affine commutes with
    # bilinear resampling).  antialias=False matches torch F.interpolate.
    normalized = jax.image.resize(norm_small, (bi, ci, 224, 224),
                                  method="bilinear", antialias=False)

    # TODO(synk): clip.encode_image(normalized) is an external pretrained CLIP;
    # `clip_embedding` stands in for its output (L2-normalized in kernel 2).
    pred, loss = fmri_head(emb_n, params["w_pad"], params["bias_pad"],
                           params["roi_sum"], clip_guidance_scale,
                           params["tile_v"], params["n_voxels"],
                           params["vmem_limit"])

    # TODO(synk): image_grads (uint8 visualization of d(loss)/d(normalized))
    # needs autograd through the external CLIP and is not reproducible here.
    return sample, normalized, pred, loss, noise_pred_guided


if __name__ == "__main__":
    key = jax.random.PRNGKey(0)
    k1, k2, k3, k4, k5, k6, k7 = jax.random.split(key, 7)

    B, C, H, W = 1, 4, 16, 16          # latent (small SD-style latent)
    HI = WI = 32                       # decoded image spatial (stand-in VAE out)
    D, V = 512, 256                    # CLIP dim, #ROI voxels

    latent = jax.random.normal(k1, (B, C, H, W), jnp.float32)
    noise_pred = jax.random.normal(k2, (B, C, H, W), jnp.float32)
    decoded_image = jnp.tanh(jax.random.normal(k3, (B, 3, HI, WI), jnp.float32))
    clip_embedding = jax.random.normal(k4, (B, D), jnp.float32)
    latent_grads = 1e-3 * jax.random.normal(k5, (B, C, H, W), jnp.float32)

    # Deterministic synthetic fMRI encoder weights (post-ROI-selection, W.T).
    weight = 0.02 * jax.random.normal(k6, (D, V), jnp.float32)
    bias = 0.01 * jax.random.normal(k7, (V,), jnp.float32)
    roi = jnp.ones((V,), jnp.float32)

    params = braindive_setup(weight, bias, roi, decoded_image.shape)

    alpha_prod_t = jnp.float32(0.9)
    clip_guidance_scale = 130.0

    outs = braindive_guidance_step(params, latent, noise_pred, decoded_image,
                                   clip_embedding, latent_grads,
                                   alpha_prod_t, clip_guidance_scale)
    jax.block_until_ready(outs)
    print("KERNEL_OK")
</pallas_src>

<mosaic_0001>
module attributes {stable_mosaic.version = 11 : i64} {
  func.func @_sched_guidance_kernel(%arg0: i32, %arg1: memref<3xf32, #tpu.memory_space<smem>>, %arg2: memref<8x128xf32, #tpu.memory_space<vmem>>, %arg3: memref<8x128xf32, #tpu.memory_space<vmem>>, %arg4: memref<8x128xf32, #tpu.memory_space<vmem>>, %arg5: memref<8x128xf32, #tpu.memory_space<vmem>>, %arg6: memref<8x128xf32, #tpu.memory_space<vmem>>) attributes {dimension_semantics = [#tpu.dimension_semantics<arbitrary>], iteration_bounds = array<i64: 1>, scalar_prefetch = 0 : i64, scratch_operands = 0 : i64, tpu.core_type = #tpu.core_type<tc>, window_params = [{transform_indices = @transform_0, window_bounds = array<i64: 3>}, {pipeline_mode = #tpu.pipeline_mode<synchronous>, transform_indices = @transform_1, window_bounds = array<i64: 8, 128>}, {pipeline_mode = #tpu.pipeline_mode<synchronous>, transform_indices = @transform_2, window_bounds = array<i64: 8, 128>}, {pipeline_mode = #tpu.pipeline_mode<synchronous>, transform_indices = @transform_3, window_bounds = array<i64: 8, 128>}, {pipeline_mode = #tpu.pipeline_mode<synchronous>, transform_indices = @transform_4, window_bounds = array<i64: 8, 128>}, {pipeline_mode = #tpu.pipeline_mode<synchronous>, transform_indices = @transform_5, window_bounds = array<i64: 8, 128>}]} {
    %c0 = arith.constant 0 : index
    %0 = memref.load %arg1[%c0] : memref<3xf32, #tpu.memory_space<smem>>
    %c1 = arith.constant 1 : index
    %1 = memref.load %arg1[%c1] : memref<3xf32, #tpu.memory_space<smem>>
    %c2 = arith.constant 2 : index
    %2 = memref.load %arg1[%c2] : memref<3xf32, #tpu.memory_space<smem>>
    %c0_0 = arith.constant 0 : index
    %c0_1 = arith.constant 0 : index
    %3 = vector.load %arg3[%c0_0, %c0_1] : memref<8x128xf32, #tpu.memory_space<vmem>>, vector<8x128xf32>
    %c0_2 = arith.constant 0 : index
    %c0_3 = arith.constant 0 : index
    %4 = vector.load %arg2[%c0_2, %c0_3] : memref<8x128xf32, #tpu.memory_space<vmem>>, vector<8x128xf32>
    %5 = vector.broadcast %0 : f32 to vector<8x128xf32>
    %6 = arith.mulf %5, %4 : vector<8x128xf32>
    %7 = vector.broadcast %1 : f32 to vector<8x128xf32>
    %8 = arith.mulf %7, %3 : vector<8x128xf32>
    %9 = arith.addf %6, %8 : vector<8x128xf32>
    %c0_4 = arith.constant 0 : index
    %c0_5 = arith.constant 0 : index
    %10 = vector.load %arg5[%c0_4, %c0_5] : memref<8x128xf32, #tpu.memory_space<vmem>>, vector<8x128xf32>
    tpu.vector_store %arg5[%c0_4, %c0_5], %9 {strides = array<i32>} : memref<8x128xf32, #tpu.memory_space<vmem>>, vector<8x128xf32>,
    %c0_6 = arith.constant 0 : index
    %c0_7 = arith.constant 0 : index
    %11 = vector.load %arg4[%c0_6, %c0_7] : memref<8x128xf32, #tpu.memory_space<vmem>>, vector<8x128xf32>
    %12 = vector.broadcast %2 : f32 to vector<8x128xf32>
    %13 = arith.mulf %12, %11 : vector<8x128xf32>
    %14 = arith.subf %3, %13 : vector<8x128xf32>
    %c0_8 = arith.constant 0 : index
    %c0_9 = arith.constant 0 : index
    %15 = vector.load %arg6[%c0_8, %c0_9] : memref<8x128xf32, #tpu.memory_space<vmem>>, vector<8x128xf32>
    tpu.vector_store %arg6[%c0_8, %c0_9], %14 {strides = array<i32>} : memref<8x128xf32, #tpu.memory_space<vmem>>, vector<8x128xf32>,
    return
  }
  func.func @transform_0(%arg0: i32) -> i32 {
    %c0_i32 = arith.constant 0 : i32
    %c0_i32_0 = arith.constant 0 : i32
    return %c0_i32 : i32
  }
  func.func @transform_1(%arg0: i32) -> (i32, i32) {
    %c0_i32 = arith.constant 0 : i32
    %c0_i32_0 = arith.constant 0 : i32
    %c0_i32_1 = arith.constant 0 : i32
    return %c0_i32, %c0_i32_0 : i32, i32
  }
  func.func @transform_2(%arg0: i32) -> (i32, i32) {
    %c0_i32 = arith.constant 0 : i32
    %c0_i32_0 = arith.constant 0 : i32
    %c0_i32_1 = arith.constant 0 : i32
    return %c0_i32, %c0_i32_0 : i32, i32
  }
  func.func @transform_3(%arg0: i32) -> (i32, i32) {
    %c0_i32 = arith.constant 0 : i32
    %c0_i32_0 = arith.constant 0 : i32
    %c0_i32_1 = arith.constant 0 : i32
    return %c0_i32, %c0_i32_0 : i32, i32
  }
  func.func @transform_4(%arg0: i32) -> (i32, i32) {
    %c0_i32 = arith.constant 0 : i32
    %c0_i32_0 = arith.constant 0 : i32
    %c0_i32_1 = arith.constant 0 : i32
    return %c0_i32, %c0_i32_0 : i32, i32
  }
  func.func @transform_5(%arg0: i32) -> (i32, i32) {
    %c0_i32 = arith.constant 0 : i32
    %c0_i32_0 = arith.constant 0 : i32
    %c0_i32_1 = arith.constant 0 : i32
    return %c0_i32, %c0_i32_0 : i32, i32
  }
}

</mosaic_0001>

<bundles_post_ra>
// kernel: tpu_custom_call.1
= control target key start
LH: loop header
LB: loop body
LE: loop exit
PB: predicated region body
PF: predicated region fallthrough
CT: control target
= control target key end

     0   :  { %11 = vsyncpa [#allocation5], 0  ;;  %s316_s0 = inlined_call_operand.hbm [shape: f32[3], index: 0, kind: input, shape index: {}]   ;;  %s317_s1 = inlined_call_operand.hbm [shape: f32[8,128], index: 1, kind: input, shape index: {}]   ;;  %s318_s2 = inlined_call_operand.hbm [shape: f32[8,128], index: 2, kind: input, shape index: {}]   ;;  %s319_s3 = inlined_call_operand.vmem [shape: f32[8,128], index: 3, kind: input, shape index: {}]   ;;  %s320_s4 = inlined_call_operand.hbm [shape: f32[8,128], index: 4, kind: output, shape index: {0}]   ;;  %s321_s5 = inlined_call_operand.hbm [shape: f32[8,128], index: 5, kind: output, shape index: {1}]  }
   0x1   :  { %12 = vsyncpa [#allocation3], 0 }
   0x2   :  { %13 = vsyncpa [#allocation8], 0 }
   0x3   :  { %14 = vsyncpa [#allocation4], 0 }
   0x4   :  { %15 = vsyncpa [#allocation11], 0  ;;  %s110_s20 = scalar_lea.hbm %s316_s0, 16 }
   0x5   :  { %p111_p0 = scmp.ne.s32.totalorder %s316_s0, %s110_s20  ;;  %p114_p1 = scmp.lt.u32.totalorder %s110_s20, %s316_s0 }
   0x7   :  { %p116_p2 = pnand %p114_p1, %p111_p0 }
   0x9   :  { %119 = shalt.err (!%p116_p2)
}
   0xa   :  { %s218_s25 = smov [#allocation2]   ;;  %s219_s28 = smov [#allocation6]  }
   0xb   :  { %23 = dma.hbm_to_smem %s316_s0, 16, %s218_s25, [#allocation5]  }
   0xc   :  { %s30_s29 = sshll.u32 %s219_s28, 4  ;;  %s220_s30 = smov [#allocation7]   ;;  %s31_s29 = int_to_ptr.vmem [resolvable:$true] %s30_s29 }
   0xd   :  { %s40_s6 = sshll.u32 %s220_s30, 4  ;;  %s120_s9 = scalar_lea.hbm %s317_s1, 128  ;;  %s41_s6 = int_to_ptr.vmem [resolvable:$true] %s40_s6 }
   0xe   :  { %p121_p3 = scmp.ne.s32.totalorder %s317_s1, %s120_s9  ;;  %p124_p4 = scmp.lt.u32.totalorder %s120_s9, %s317_s1 }
  0x10   :  { %p126_p5 = pnand %p124_p4, %p121_p3 }
  0x12   :  { %129 = shalt.err (!%p126_p5)
}
  0x13   :  { %s130_s0 = scalar_lea.vmem %s31_s29, 128  ;;  %p135_p7 = scmp.lt.s32.totalorder %s31_s29, %s31_s29 }
  0x14   :  { %p131_p6 = scmp.ne.s32.totalorder %s31_s29, %s130_s0  ;;  %p136_p8 = scmp.lt.s32.totalorder %s130_s0, %s130_s0 }
  0x16   :  { %p137_p9 = por %p136_p8, %p135_p7 }
  0x18   :  { %p138_p10 = pnand %p137_p9, %p131_p6 }
  0x1a   :  { %141 = shalt.err (!%p138_p10)
}
  0x1b   :  { %33 = dma.hbm_to_vmem [thread:$0]  %s317_s1, 128, %s31_s29, [#allocation3]  }
  0x1c   :  { %s142_s18 = scalar_lea.hbm %s318_s2, 128 }
  0x1d   :  { %p143_p11 = scmp.ne.s32.totalorder %s318_s2, %s142_s18  ;;  %p146_p12 = scmp.lt.u32.totalorder %s142_s18, %s318_s2 }
  0x1f   :  { %p148_p13 = pnand %p146_p12, %p143_p11 }
  0x21   :  { %151 = shalt.err (!%p148_p13)
}
  0x22   :  { %s152_s23 = scalar_lea.vmem %s41_s6, 128  ;;  %p157_p1 = scmp.lt.s32.totalorder %s41_s6, %s41_s6 }
  0x23   :  { %p153_p0 = scmp.ne.s32.totalorder %s41_s6, %s152_s23  ;;  %p158_p2 = scmp.lt.s32.totalorder %s152_s23, %s152_s23 }
  0x25   :  { %p159_p3 = por %p158_p2, %p157_p1 }
  0x27   :  { %p160_p4 = pnand %p159_p3, %p153_p0 }
  0x29   :  { %163 = shalt.err (!%p160_p4)
}
  0x2a   :  { %43 = dma.hbm_to_vmem [thread:$0]  %s318_s2, 128, %s41_s6, [#allocation8]  }
  0x2b   :  { %208 = dma.done.wait [#allocation5], 16  }
  0x2c   :  { %209 = vsyncadd [#allocation5], 4294967280 }
  0x2d   :  { %210 = dma.done.wait [#allocation3], 128  }
  0x2e   :  { %211 = vsyncadd [#allocation3], 4294967168 }
  0x2f   :  { %212 = dma.done.wait [#allocation8], 128  }
  0x30   :  { %213 = vsyncadd [#allocation8], 4294967168 }
  0x31   :  { %55 = sfence }
  0x32   :  { %s56_s25 = sld [smem:[#allocation2]]  ;;  %s103_s26 = sld [smem:[#allocation2 + $0x1]]  ;;  %v59_v0 = vld [vmem:[#allocation7] sm:$0xff]  ;;  %v60_v1 = vld [vmem:[#allocation6] sm:$0xff]  ;;  %v67_v2 = vld [vmem:[%s319_s3] sm:$0xff] }
  0x33   :  { %s104_s27 = sld [smem:[#allocation2 + $0x2]]  ;;  %s221_s30 = smov [#allocation9]  }
  0x34   :  { %s78_s2 = sshll.u32 %s221_s30, 4  ;;  %s222_s6 = smov [#allocation10]   ;;  %s79_s2 = int_to_ptr.vmem [resolvable:$true] %s78_s2 }
  0x35   :  { %s88_s7 = sshll.u32 %s222_s6, 4  ;;  %s164_s8 = scalar_lea.vmem %s79_s2, 128  ;;  %s89_s7 = int_to_ptr.vmem [resolvable:$true] %s88_s7 }
  0x36   :  { %p165_p5 = scmp.ne.s32.totalorder %s79_s2, %s164_s8  ;;  %p169_p6 = scmp.lt.s32.totalorder %s79_s2, %s79_s2 }
  0x37   :  { %p170_p7 = scmp.lt.s32.totalorder %s164_s8, %s164_s8 }
  0x38   :  { %v61_v3 = vstv %s56_s25  ;;  %v63_v4 = vstv %s103_s26 }
  0x39   :  { %v62_v5 = vmul.f32 %v61_v3, %v60_v1  ;;  %v64_v6 = vmul.f32 %v63_v4, %v59_v0  ;;  %v68_v7 = vstv %s104_s27  ;;  %p171_p8 = por %p170_p7, %p169_p6 }
  0x3a   :  { %v69_v8 = vmul.f32 %v68_v7, %v67_v2 }
  0x3b   :  { %v65_v9 = vadd.f32 %v64_v6, %v62_v5  ;;  %p172_p9 = pnand %p171_p8, %p165_p5 }
  0x3c   :  { %v70_v10 = vsub.f32 %v59_v0, %v69_v8 }
  0x3d   :  { %66 = vst [vmem:[#allocation9] sm:$0xff] %v65_v9 }
  0x3e   :  { %71 = vst [vmem:[#allocation10] sm:$0xff] %v70_v10 }
  0x3f   :  { %175 = shalt.err (!%p172_p9)
}
  0x40   :  { %s176_s10 = scalar_lea.hbm %s320_s4, 128 }
  0x41   :  { %p177_p10 = scmp.ne.s32.totalorder %s320_s4, %s176_s10  ;;  %p180_p11 = scmp.lt.u32.totalorder %s176_s10, %s320_s4 }
  0x43   :  { %p182_p12 = pnand %p180_p11, %p177_p10 }
  0x45   :  { %185 = shalt.err (!%p182_p12)
}
  0x46   :  { %81 = dma.vmem_to_hbm [thread:$0]  %s79_s2, 128, %s320_s4, [#allocation4]  }
  0x47   :  { %s186_s16 = scalar_lea.vmem %s89_s7, 128  ;;  %p191_p0 = scmp.lt.s32.totalorder %s89_s7, %s89_s7 }
  0x48   :  { %p187_p13 = scmp.ne.s32.totalorder %s89_s7, %s186_s16  ;;  %p192_p1 = scmp.lt.s32.totalorder %s186_s16, %s186_s16 }
  0x4a   :  { %p193_p2 = por %p192_p1, %p191_p0 }
  0x4c   :  { %p194_p3 = pnand %p193_p2, %p187_p13 }
  0x4e   :  { %197 = shalt.err (!%p194_p3)
}
  0x4f   :  { %s198_s19 = scalar_lea.hbm %s321_s5, 128 }
  0x50   :  { %p199_p4 = scmp.ne.s32.totalorder %s321_s5, %s198_s19  ;;  %p202_p5 = scmp.lt.u32.totalorder %s198_s19, %s321_s5 }
  0x52   :  { %p204_p6 = pnand %p202_p5, %p199_p4 }
  0x54   :  { %207 = shalt.err (!%p204_p6)
}
  0x55   :  { %91 = dma.vmem_to_hbm [thread:$0]  %s89_s7, 128, %s321_s5, [#allocation11]  }
  0x56   :  { %214 = dma.done.wait [#allocation4], 128  }
  0x57   :  { %215 = vsyncadd [#allocation4], 4294967168 }
  0x58   :  { %216 = dma.done.wait [#allocation11], 128  }
  0x59   :  { %217 = vsyncadd [#allocation11], 4294967168 }
  0x5a   :  { %98 = vsyncpa [#allocation3], 1 }
  0x5b   :  { %99 = vsyncpa [#allocation8], 1 }
  0x5c   :  { %100 = vsyncpa [#allocation4], 1 }
  0x5d   :  { %101 = vsyncpa [#allocation11], 1 }
  0x5e   :  { %102 = vsyncpa [#allocation5], 1 }

</bundles_post_ra>
